<compile_context>
chip_gen: v7x
topology: tpu7x:2x2x1
jax: 0.10.0
libtpu: 0.0.40
codegen_flags: <defaults>
</compile_context>

<pallas_src>
import jax
import jax.numpy as jnp
import numpy as np
from jax.experimental import pallas as pl
from jax.experimental.pallas import tpu as pltpu

NEG_SLOPE = 0.01
BN_EPS = 1e-5


def _round_up(x, m):
    return ((x + m - 1) // m) * m


def _leaky_relu(x):
    return jnp.where(x > 0, x, NEG_SLOPE * x)


def travel_time_kernel(
    ids_ref,    # (1, TB)            i32   unit ids (clamped in wrapper)
    dense_ref,  # (D_day+2, TB)      f32   [day_type ; len ; dep] transposed
    w1e_ref,    # (64, U)            f32   (emb_tab @ W1_emb).T, BN1-folded
    w1d_ref,    # (64, D_day+2)      f32   stacked dense W1, BN1-folded
    b1_ref,     # (64, 1)            f32   BN1-folded bias
    w2_ref,     # (32, 64)           f32   BN2-folded
    b2_ref,     # (32, 1)            f32   BN2-folded bias
    w3_ref,     # (1, 32)            f32
    b3_ref,     # (1, 1)             f32
    out_ref,    # (1, TB)            f32
):
    U = w1e_ref.shape[1]
    tb = ids_ref.shape[1]

    # Embedding lookup as one-hot matmul against the pre-folded (64, U) weight.
    ids = ids_ref[...]                                              # (1, TB)
    iota_u = jax.lax.broadcasted_iota(jnp.int32, (U, tb), 0)        # (U, TB)
    onehot = (iota_u == ids).astype(jnp.float32)                    # (U, TB)

    # fc1 (+ folded BN1) + leaky_relu
    h1 = (
        jnp.dot(w1e_ref[...], onehot, preferred_element_type=jnp.float32)
        + jnp.dot(w1d_ref[...], dense_ref[...], preferred_element_type=jnp.float32)
        + b1_ref[...]
    )                                                               # (64, TB)
    h1 = _leaky_relu(h1)
    # dropout(p=0.3) == identity at inference.

    # fc2 (+ folded BN2) + leaky_relu
    h2 = jnp.dot(w2_ref[...], h1, preferred_element_type=jnp.float32) + b2_ref[...]
    h2 = _leaky_relu(h2)                                            # (32, TB)

    # fc3 -> lane-dense (1, TB) store
    out_ref[...] = (
        jnp.dot(w3_ref[...], h2, preferred_element_type=jnp.float32) + b3_ref[...]
    )


def travel_time_forward(params, day_type, businfo_unit_id, len_feature,
                        dep_hour_min, *, tile_b=1024):
    """Inference forward pass. Returns (B, 1) float32."""
    B, D_day = day_type.shape
    U, E = params["emb"].shape

    # ---- constant folding (wrapper side) --------------------------------
    s1 = params["bn1_gamma"] / jnp.sqrt(params["bn1_var"] + BN_EPS)
    b1_eff = (params["b1"] - params["bn1_mean"]) * s1 + params["bn1_beta"]
    w1 = params["w1"]                                  # (D_day + E + 2, 64)
    w1_day = w1[:D_day]
    w1_emb = w1[D_day:D_day + E]
    w1_rest = w1[D_day + E:]
    w1_dense = jnp.concatenate([w1_day, w1_rest], axis=0)          # (D_day+2, 64)
    w1d_T = (w1_dense * s1[None, :]).T                             # (64, D_day+2)
    w1e_T = ((params["emb"] @ w1_emb) * s1[None, :]).T             # (64, U)

    s2 = params["bn2_gamma"] / jnp.sqrt(params["bn2_var"] + BN_EPS)
    b2_eff = (params["b2"] - params["bn2_mean"]) * s2 + params["bn2_beta"]
    w2_T = (params["w2"] * s2[None, :]).T                          # (32, 64)
    w3_T = params["w3"].T                                          # (1, 32)

    # ---- batch-transposed, merged input streams -------------------------
    dense = jnp.concatenate(
        [day_type.astype(jnp.float32),
         len_feature.astype(jnp.float32)[:, None],
         dep_hour_min.astype(jnp.float32)[:, None]], axis=1
    ).T                                                            # (D_day+2, B)
    ids = jnp.clip(businfo_unit_id.reshape(1, B).astype(jnp.int32), 0, U - 1)

    # Pad batch (lane axis) to a multiple of the tile size.
    tile_b = min(tile_b, _round_up(B, 128))
    Bp = _round_up(B, tile_b)
    if Bp != B:
        dense = jnp.pad(dense, ((0, 0), (0, Bp - B)))
        ids = jnp.pad(ids, ((0, 0), (0, Bp - B)))

    col = lambda v: v.reshape(-1, 1).astype(jnp.float32)
    b1c, b2c, b3c = col(b1_eff), col(b2_eff), col(params["b3"])

    tiled = lambda rows: pl.BlockSpec((rows, tile_b), lambda i: (0, i))
    resident = lambda shape: pl.BlockSpec(shape, lambda i: (0, 0))

    out = pl.pallas_call(
        travel_time_kernel,
        out_shape=jax.ShapeDtypeStruct((1, Bp), jnp.float32),
        grid_spec=pltpu.PrefetchScalarGridSpec(
            num_scalar_prefetch=0,
            grid=(Bp // tile_b,),
            in_specs=[
                tiled(1),                      # ids      (streamed)
                tiled(D_day + 2),              # dense    (streamed)
                resident(w1e_T.shape),         # weights  (VMEM-resident)
                resident(w1d_T.shape),
                resident(b1c.shape),
                resident(w2_T.shape),
                resident(b2c.shape),
                resident(w3_T.shape),
                resident(b3c.shape),
            ],
            out_specs=tiled(1),
        ),
        compiler_params=pltpu.CompilerParams(
            dimension_semantics=("parallel",)),
    )(ids, dense, w1e_T, w1d_T, b1c, w2_T, b2c, w3_T, b3c)

    return out[0, :B].reshape(B, 1)


def init_params(key, input_size, num_units, unit_embedding_dim):
    """Deterministic synthetic parameters (shapes match the PyTorch module)."""
    ks = jax.random.split(key, 12)
    f_in = input_size + unit_embedding_dim

    def lin(k, fan_in, fan_out):
        kw, kb = jax.random.split(k)
        bound = 1.0 / np.sqrt(fan_in)
        w = jax.random.uniform(kw, (fan_in, fan_out), jnp.float32, -bound, bound)
        b = jax.random.uniform(kb, (fan_out,), jnp.float32, -bound, bound)
        return w, b

    w1, b1 = lin(ks[0], f_in, 64)
    w2, b2 = lin(ks[1], 64, 32)
    w3, b3 = lin(ks[2], 32, 1)
    return {
        "emb": jax.random.normal(ks[3], (num_units, unit_embedding_dim), jnp.float32),
        "w1": w1, "b1": b1,
        "w2": w2, "b2": b2,
        "w3": w3, "b3": b3,
        "bn1_gamma": 1.0 + 0.1 * jax.random.normal(ks[4], (64,), jnp.float32),
        "bn1_beta": 0.1 * jax.random.normal(ks[5], (64,), jnp.float32),
        "bn1_mean": 0.05 * jax.random.normal(ks[6], (64,), jnp.float32),
        "bn1_var": jnp.abs(1.0 + 0.1 * jax.random.normal(ks[7], (64,), jnp.float32)),
        "bn2_gamma": 1.0 + 0.1 * jax.random.normal(ks[8], (32,), jnp.float32),
        "bn2_beta": 0.1 * jax.random.normal(ks[9], (32,), jnp.float32),
        "bn2_mean": 0.05 * jax.random.normal(ks[10], (32,), jnp.float32),
        "bn2_var": jnp.abs(1.0 + 0.1 * jax.random.normal(ks[11], (32,), jnp.float32)),
    }


def reference_forward(params, day_type, ids, len_feature, dep_hour_min):
    """Pure-JAX reference (mirrors the PyTorch forward in eval mode)."""
    emb = params["emb"][ids.reshape(-1)]                       # (B, E)
    x = jnp.concatenate(
        [day_type, emb, len_feature[:, None], dep_hour_min[:, None]], axis=1)
    h1 = x @ params["w1"] + params["b1"]
    h1 = (h1 - params["bn1_mean"]) / jnp.sqrt(params["bn1_var"] + BN_EPS)
    h1 = h1 * params["bn1_gamma"] + params["bn1_beta"]
    h1 = jnp.where(h1 > 0, h1, NEG_SLOPE * h1)
    h2 = h1 @ params["w2"] + params["b2"]
    h2 = (h2 - params["bn2_mean"]) / jnp.sqrt(params["bn2_var"] + BN_EPS)
    h2 = h2 * params["bn2_gamma"] + params["bn2_beta"]
    h2 = jnp.where(h2 > 0, h2, NEG_SLOPE * h2)
    return h2 @ params["w3"] + params["b3"]


if __name__ == "__main__":
    # Small, forward-consistent shapes:
    #   day_type: (B, 6), businfo_unit_id: (B, 1), len_feature: (B,), dep_hour_min: (B,)
    #   input_size = 6 + 2 = 8, num_units = 16, unit_embedding_dim = 8
    B, D_DAY, NUM_UNITS, EMB_DIM = 8, 6, 16, 8
    INPUT_SIZE = D_DAY + 2

    key = jax.random.PRNGKey(0)
    k_p, k_day, k_id, k_len, k_dep = jax.random.split(key, 5)

    params = init_params(k_p, INPUT_SIZE, NUM_UNITS, EMB_DIM)
    day_type = jax.random.normal(k_day, (B, D_DAY), jnp.float32)
    businfo_unit_id = jax.random.randint(k_id, (B, 1), 0, NUM_UNITS, jnp.int32)
    len_feature = jax.random.uniform(k_len, (B,), jnp.float32)
    dep_hour_min = jax.random.uniform(k_dep, (B,), jnp.float32)

    out = travel_time_forward(params, day_type, businfo_unit_id,
                              len_feature, dep_hour_min)
    out = jax.block_until_ready(out)

    ref = reference_forward(params, day_type, businfo_unit_id,
                            len_feature, dep_hour_min)
    np.testing.assert_allclose(np.asarray(out), np.asarray(ref),
                               rtol=2e-5, atol=2e-5)

    print("KERNEL_OK")
</pallas_src>

<mosaic_0001>
module attributes {stable_mosaic.version = 11 : i64} {
  func.func @travel_time_kernel(%arg0: i32, %arg1: memref<1x128xi32, #tpu.memory_space<vmem>>, %arg2: memref<8x128xf32, #tpu.memory_space<vmem>>, %arg3: memref<64x16xf32, #tpu.memory_space<vmem>>, %arg4: memref<64x8xf32, #tpu.memory_space<vmem>>, %arg5: memref<64x1xf32, #tpu.memory_space<vmem>>, %arg6: memref<32x64xf32, #tpu.memory_space<vmem>>, %arg7: memref<32x1xf32, #tpu.memory_space<vmem>>, %arg8: memref<1x32xf32, #tpu.memory_space<vmem>>, %arg9: memref<1x1xf32, #tpu.memory_space<vmem>>, %arg10: memref<1x128xf32, #tpu.memory_space<vmem>>) attributes {dimension_semantics = [#tpu.dimension_semantics<parallel>], iteration_bounds = array<i64: 1>, scalar_prefetch = 0 : i64, scratch_operands = 0 : i64, tpu.core_type = #tpu.core_type<tc>, window_params = [{transform_indices = @transform_0, window_bounds = array<i64: 1, 128>}, {transform_indices = @transform_1, window_bounds = array<i64: 8, 128>}, {pipeline_mode = #tpu.pipeline_mode<synchronous>, transform_indices = @transform_2, window_bounds = array<i64: 64, 16>}, {pipeline_mode = #tpu.pipeline_mode<synchronous>, transform_indices = @transform_3, window_bounds = array<i64: 64, 8>}, {pipeline_mode = #tpu.pipeline_mode<synchronous>, transform_indices = @transform_4, window_bounds = array<i64: 64, 1>}, {pipeline_mode = #tpu.pipeline_mode<synchronous>, transform_indices = @transform_5, window_bounds = array<i64: 32, 64>}, {pipeline_mode = #tpu.pipeline_mode<synchronous>, transform_indices = @transform_6, window_bounds = array<i64: 32, 1>}, {pipeline_mode = #tpu.pipeline_mode<synchronous>, transform_indices = @transform_7, window_bounds = array<i64: 1, 32>}, {pipeline_mode = #tpu.pipeline_mode<synchronous>, transform_indices = @transform_8, window_bounds = array<i64: 1, 1>}, {transform_indices = @transform_9, window_bounds = array<i64: 1, 128>}]} {
    %c0 = arith.constant 0 : index
    %c0_0 = arith.constant 0 : index
    %0 = vector.load %arg1[%c0, %c0_0] : memref<1x128xi32, #tpu.memory_space<vmem>>, vector<1x128xi32>
    %1 = tpu.iota {dimensions = array<i32: 0>} : vector<16x128xi32>
    %2 = vector.broadcast %0 : vector<1x128xi32> to vector<16x128xi32>
    %3 = arith.cmpi eq, %1, %2 : vector<16x128xi32>
    %4 = arith.extui %3 : vector<16x128xi1> to vector<16x128xi32>
    %5 = arith.sitofp %4 : vector<16x128xi32> to vector<16x128xf32>
    %c0_1 = arith.constant 0 : index
    %c0_2 = arith.constant 0 : index
    %6 = vector.load %arg3[%c0_1, %c0_2] : memref<64x16xf32, #tpu.memory_space<vmem>>, vector<64x16xf32>
    %cst = arith.constant dense<0.000000e+00> : vector<64x128xf32>
    %7 = tpu.matmul %6, %5, %cst {dimension_numbers = #tpu.dot_dimension_numbers<[1], [0], [0], [1], [0, 0, 1, 1], [], []>} : vector<64x16xf32>, vector<16x128xf32>, vector<64x128xf32> -> vector<64x128xf32>
    %c0_3 = arith.constant 0 : index
    %c0_4 = arith.constant 0 : index
    %8 = vector.load %arg4[%c0_3, %c0_4] : memref<64x8xf32, #tpu.memory_space<vmem>>, vector<64x8xf32>
    %c0_5 = arith.constant 0 : index
    %c0_6 = arith.constant 0 : index
    %9 = vector.load %arg2[%c0_5, %c0_6] : memref<8x128xf32, #tpu.memory_space<vmem>>, vector<8x128xf32>
    %cst_7 = arith.constant dense<0.000000e+00> : vector<64x128xf32>
    %10 = tpu.matmul %8, %9, %cst_7 {dimension_numbers = #tpu.dot_dimension_numbers<[1], [0], [0], [1], [0, 0, 1, 1], [], []>} : vector<64x8xf32>, vector<8x128xf32>, vector<64x128xf32> -> vector<64x128xf32>
    %11 = arith.addf %7, %10 : vector<64x128xf32>
    %c0_8 = arith.constant 0 : index
    %c0_9 = arith.constant 0 : index
    %12 = vector.load %arg5[%c0_8, %c0_9] : memref<64x1xf32, #tpu.memory_space<vmem>>, vector<64x1xf32>
    %13 = vector.broadcast %12 : vector<64x1xf32> to vector<64x128xf32>
    %14 = arith.addf %11, %13 : vector<64x128xf32>
    %cst_10 = arith.constant 0.000000e+00 : f32
    %15 = vector.broadcast %cst_10 : f32 to vector<64x128xf32>
    %16 = arith.cmpf ogt, %14, %15 : vector<64x128xf32>
    %cst_11 = arith.constant 0.00999999977 : f32
    %17 = vector.broadcast %cst_11 : f32 to vector<64x128xf32>
    %18 = arith.mulf %17, %14 : vector<64x128xf32>
    %19 = arith.select %16, %14, %18 : vector<64x128xi1>, vector<64x128xf32>
    %c0_12 = arith.constant 0 : index
    %c0_13 = arith.constant 0 : index
    %20 = vector.load %arg6[%c0_12, %c0_13] : memref<32x64xf32, #tpu.memory_space<vmem>>, vector<32x64xf32>
    %cst_14 = arith.constant dense<0.000000e+00> : vector<32x128xf32>
    %21 = tpu.matmul %20, %19, %cst_14 {dimension_numbers = #tpu.dot_dimension_numbers<[1], [0], [0], [1], [0, 0, 1, 1], [], []>} : vector<32x64xf32>, vector<64x128xf32>, vector<32x128xf32> -> vector<32x128xf32>
    %c0_15 = arith.constant 0 : index
    %c0_16 = arith.constant 0 : index
    %22 = vector.load %arg7[%c0_15, %c0_16] : memref<32x1xf32, #tpu.memory_space<vmem>>, vector<32x1xf32>
    %23 = vector.broadcast %22 : vector<32x1xf32> to vector<32x128xf32>
    %24 = arith.addf %21, %23 : vector<32x128xf32>
    %cst_17 = arith.constant 0.000000e+00 : f32
    %25 = vector.broadcast %cst_17 : f32 to vector<32x128xf32>
    %26 = arith.cmpf ogt, %24, %25 : vector<32x128xf32>
    %cst_18 = arith.constant 0.00999999977 : f32
    %27 = vector.broadcast %cst_18 : f32 to vector<32x128xf32>
    %28 = arith.mulf %27, %24 : vector<32x128xf32>
    %29 = arith.select %26, %24, %28 : vector<32x128xi1>, vector<32x128xf32>
    %c0_19 = arith.constant 0 : index
    %c0_20 = arith.constant 0 : index
    %30 = vector.load %arg8[%c0_19, %c0_20] : memref<1x32xf32, #tpu.memory_space<vmem>>, vector<1x32xf32>
    %cst_21 = arith.constant dense<0.000000e+00> : vector<1x128xf32>
    %31 = tpu.matmul %30, %29, %cst_21 {dimension_numbers = #tpu.dot_dimension_numbers<[1], [0], [0], [1], [0, 0, 1, 1], [], []>} : vector<1x32xf32>, vector<32x128xf32>, vector<1x128xf32> -> vector<1x128xf32>
    %c0_22 = arith.constant 0 : index
    %c0_23 = arith.constant 0 : index
    %32 = vector.load %arg9[%c0_22, %c0_23] : memref<1x1xf32, #tpu.memory_space<vmem>>, vector<1x1xf32>
    %33 = vector.broadcast %32 : vector<1x1xf32> to vector<1x128xf32>
    %34 = arith.addf %31, %33 : vector<1x128xf32>
    %c0_24 = arith.constant 0 : index
    %c0_25 = arith.constant 0 : index
    %35 = vector.load %arg10[%c0_24, %c0_25] : memref<1x128xf32, #tpu.memory_space<vmem>>, vector<1x128xf32>
    tpu.vector_store %arg10[%c0_24, %c0_25], %34 {strides = array<i32>} : memref<1x128xf32, #tpu.memory_space<vmem>>, vector<1x128xf32>,
    return
  }
  func.func @transform_0(%arg0: i32) -> (i32, i32) {
    %c0_i32 = arith.constant 0 : i32
    %c0_i32_0 = arith.constant 0 : i32
    return %c0_i32, %arg0 : i32, i32
  }
  func.func @transform_1(%arg0: i32) -> (i32, i32) {
    %c0_i32 = arith.constant 0 : i32
    %c0_i32_0 = arith.constant 0 : i32
    return %c0_i32, %arg0 : i32, i32
  }
  func.func @transform_2(%arg0: i32) -> (i32, i32) {
    %c0_i32 = arith.constant 0 : i32
    %c0_i32_0 = arith.constant 0 : i32
    %c0_i32_1 = arith.constant 0 : i32
    return %c0_i32, %c0_i32_0 : i32, i32
  }
  func.func @transform_3(%arg0: i32) -> (i32, i32) {
    %c0_i32 = arith.constant 0 : i32
    %c0_i32_0 = arith.constant 0 : i32
    %c0_i32_1 = arith.constant 0 : i32
    return %c0_i32, %c0_i32_0 : i32, i32
  }
  func.func @transform_4(%arg0: i32) -> (i32, i32) {
    %c0_i32 = arith.constant 0 : i32
    %c0_i32_0 = arith.constant 0 : i32
    %c0_i32_1 = arith.constant 0 : i32
    return %c0_i32, %c0_i32_0 : i32, i32
  }
  func.func @transform_5(%arg0: i32) -> (i32, i32) {
    %c0_i32 = arith.constant 0 : i32
    %c0_i32_0 = arith.constant 0 : i32
    %c0_i32_1 = arith.constant 0 : i32
    return %c0_i32, %c0_i32_0 : i32, i32
  }
  func.func @transform_6(%arg0: i32) -> (i32, i32) {
    %c0_i32 = arith.constant 0 : i32
    %c0_i32_0 = arith.constant 0 : i32
    %c0_i32_1 = arith.constant 0 : i32
    return %c0_i32, %c0_i32_0 : i32, i32
  }
  func.func @transform_7(%arg0: i32) -> (i32, i32) {
    %c0_i32 = arith.constant 0 : i32
    %c0_i32_0 = arith.constant 0 : i32
    %c0_i32_1 = arith.constant 0 : i32
    return %c0_i32, %c0_i32_0 : i32, i32
  }
  func.func @transform_8(%arg0: i32) -> (i32, i32) {
    %c0_i32 = arith.constant 0 : i32
    %c0_i32_0 = arith.constant 0 : i32
    %c0_i32_1 = arith.constant 0 : i32
    return %c0_i32, %c0_i32_0 : i32, i32
  }
  func.func @transform_9(%arg0: i32) -> (i32, i32) {
    %c0_i32 = arith.constant 0 : i32
    %c0_i32_0 = arith.constant 0 : i32
    return %c0_i32, %arg0 : i32, i32
  }
}

</mosaic_0001>

<bundles_post_ra>
// kernel: tpu_custom_call.1
= control target key start
LH: loop header
LB: loop body
LE: loop exit
PB: predicated region body
PF: predicated region fallthrough
CT: control target
= control target key end

     0   :  { %s1036_s0 = inlined_call_operand.vmem [shape: s32[1,128], index: 0, kind: input, shape index: {}]   ;;  %s1037_s1 = inlined_call_operand.vmem [shape: f32[8,128], index: 1, kind: input, shape index: {}]   ;;  %s1038_s2 = inlined_call_operand.vmem [shape: f32[64,16], index: 2, kind: input, shape index: {}]   ;;  %s1039_s3 = inlined_call_operand.vmem [shape: f32[64,8], index: 3, kind: input, shape index: {}]   ;;  %s1040_s4 = inlined_call_operand.vmem [shape: f32[64,1], index: 4, kind: input, shape index: {}]   ;;  %s1041_s5 = inlined_call_operand.vmem [shape: f32[32,64], index: 5, kind: input, shape index: {}]   ;;  %s1042_s6 = inlined_call_operand.vmem [shape: f32[32,1], index: 6, kind: input, shape index: {}]   ;;  %s1043_s7 = inlined_call_operand.vmem [shape: f32[1,32], index: 7, kind: input, shape index: {}]   ;;  %s1044_s8 = inlined_call_operand.<no memory space> [shape: f32[1,1], index: 8, kind: input, shape index: {}]   ;;  %s1045_s9 = inlined_call_operand.hbm [shape: f32[1,128], index: 9, kind: output, shape index: {}]  }
   0x1   :  { %v14_v0 = vstv %s1044_s8 }
   0x2   :  { %15 = vst [vmem:[#allocation2] sm:$0x1] %v14_v0 }
   0x3   :  { %v644_v1 = vld [vmem:[%s1036_s0] ss:$0 sm:$0xff]  ;;  %v36_v2 = vlaneseq  ;;  %vm66_vm0 = vcmask 64512   ;;  %v58_v5 = vld [vmem:[%s1039_s3 + $0x8] sm:$0xff]  ;;  %vm196_vm1 = vcmask 130048   ;;  %v59_v8 = vld [vmem:[%s1039_s3 + $0x10] sm:$0xff] }
   0x4   :  { %v65_v3 = vld [vmem:[%s1037_s1] sm:$0xff]  ;;  %v60_v10 = vld [vmem:[%s1039_s3 + $0x18] sm:$0xff]  ;;  %v835_v11 = vmov 0   ;;  %v328_v14 = vld [vmem:[%s1040_s4 + $0x10] sm:$0xff]  ;;  %v836_v15 = vmov 1.0|1.0  }
   0x5   :  { %v57_v4 = vld [vmem:[%s1039_s3] sm:$0xff]  ;;  %706 = vmatprep.subr.mxu1 %v65_v3  ;;  %v909_v7 = vshrl.u32 %v36_v2, 7  ;;  %809 = vset.pattern.permute.xlu0 %v835_v11  ;;  %v62_v16 = vld [vmem:[%s1039_s3 + $0x28] sm:$0xff]  ;;  %v63_v19 = vld [vmem:[%s1039_s3 + $0x30] sm:$0xff] }
   0x6   :  { %v49_v6 = vld [vmem:[%s1038_s2] sm:$0xff]  ;;  %707 = vmatpush3.msra.mxu1 %v65_v3  ;;  %708 = vmatprep.mubr.msk.f32.mxu1 %vm66_vm0, %v57_v4  ;;  %v327_v17 = vld [vmem:[%s1040_s4 + $0x8] sm:$0xff]  ;;  %v51_v20 = vld [vmem:[%s1038_s2 + $0x10] sm:$0xff] }
   0x7   :  { %709 = vmatmul.mubr.msk.f32.vlgmr.msra.gmra.mrb[0].mxu1 %vm66_vm0, %v58_v5  ;;  %724 = vmatprep.mubr.msk.f32.mxu0 %vm196_vm1, %v49_v6  ;;  %v38_v9 = vadd.s32 8, %v909_v7  ;;  %vm43_vm2 = vcmp.eq.s32.totalorder %v909_v7, %v644_v1  ;;  %v61_v12 = vld [vmem:[%s1039_s3 + $0x20] sm:$0xff]  ;;  %v50_v18 = vld [vmem:[%s1038_s2 + $0x8] sm:$0xff]  ;;  %v329_v21 = vld [vmem:[%s1040_s4 + $0x18] sm:$0xff] }
   0x8   :  { %711 = vmatprep.mubr.msk.f32.mxu1 %vm66_vm0, %v59_v8  ;;  %810 = vset.pattern.permute.xlu1 %v835_v11  ;;  %v326_v13 = vld [vmem:[%s1040_s4] sm:$0xff] }
   0x9   :  { %vm44_vm3 = vcmp.eq.s32.totalorder %v38_v9, %v644_v1  ;;  %336 = vperm.xlu0 %809, %v326_v13   ;;  %346 = vperm.xlu1 %810, %v328_v14  }
   0xa   :  { %vm769_vm4 = vmpackc.low %vm44_vm3, %vm43_vm2 }
   0xb   :  { %712 = vmatmul.mubr.msk.f32.gmra.mrb[2].mxu1 %vm66_vm0, %v60_v10  ;;  %770 = vmatprep.subr.msk.bf16.mxu0 %vm769_vm4, %v836_v15 }
   0xc   :  { %714 = vmatprep.mubr.msk.f32.mxu1 %vm66_vm0, %v61_v12  ;;  %772 = vmatpush3.bf16.msk.msra.mxu0 %vm769_vm4, %v836_v15 }
   0xd   :  { %16 = vsyncpa [#allocation4], 0  ;;  %341 = vperm.xlu0 %809, %v327_v17   ;;  %v64_v22 = vld [vmem:[%s1039_s3 + $0x38] sm:$0xff]  ;;  %v330_v23 = vld [vmem:[%s1040_s4 + $0x20] sm:$0xff]  ;;  %351 = vperm.xlu1 %810, %v329_v21   ;;  %vm434_vm5 = vcmask 523264   ;;  %vm838_vm14 = vmmov 0  }
   0xe   :  { %v52_v24 = vld [vmem:[%s1038_s2 + $0x18] sm:$0xff]  ;;  %v53_v25 = vld [vmem:[%s1038_s2 + $0x20] sm:$0xff]  ;;  %v331_v26 = vld [vmem:[%s1040_s4 + $0x28] sm:$0xff]  ;;  %vm555_vm3 = vcmask 261120   ;;  %s840_s25 = smov [#allocation3]  }
   0xf   :  { %715 = vmatmul.mubr.msk.f32.gmra.mrb[4].mxu1 %vm66_vm0, %v62_v16  ;;  %725 = vmatmul.mubr.msk.f32.vlgmr.msra.gmra.mrb[0].mxu0 %vm196_vm1, %v50_v18  ;;  %v332_v27 = vld [vmem:[%s1040_s4 + $0x30] sm:$0xff]  ;;  %v54_v28 = vld [vmem:[%s1038_s2 + $0x28] sm:$0xff]  ;;  %v333_v30 = vld [vmem:[%s1040_s4 + $0x38] sm:$0xff]  ;;  %s636_s3 = sshll.u32 %s840_s25, 4  ;;  %s637_s3 = int_to_ptr.vmem [resolvable:$true] %s636_s3 }
  0x10   :  { %717 = vmatprep.mubr.msk.f32.mxu1 %vm66_vm0, %v63_v19  ;;  %727 = vmatprep.mubr.msk.f32.mxu0 %vm196_vm1, %v51_v20  ;;  %v55_v29 = vld [vmem:[%s1038_s2 + $0x30] sm:$0xff]  ;;  %v410_v31 = vld [vmem:[%s1042_s6] sm:$0xff]  ;;  %v56_v32 = vld [vmem:[%s1038_s2 + $0x38] sm:$0xff]  ;;  %s811_s26 = scalar_lea.vmem %s637_s3, 16  ;;  %s815_s27 = scalar_lea.vmem %s637_s3, 32 }
  0x11   :  { %356 = vperm.xlu0 %809, %v330_v23   ;;  %361 = vperm.xlu1 %810, %v331_v26   ;;  %v411_v33 = vld [vmem:[%s1042_s6 + $0x8] sm:$0xff]  ;;  %v412_v34 = vld [vmem:[%s1042_s6 + $0x10] sm:$0xff]  ;;  %v413_v35 = vld [vmem:[%s1042_s6 + $0x18] sm:$0xff]  ;;  %p812_p0 = scmp.ne.s32.totalorder %s637_s3, %s811_s26  ;;  %p816_p1 = scmp.lt.s32.totalorder %s637_s3, %s637_s3 }
  0x12   :  { %v545_v36 = vld [vmem:[#allocation2] sm:$0x1]  ;;  %p817_p2 = scmp.lt.s32.totalorder %s815_s27, %s811_s26 }
  0x13   :  { %718 = vmatmul.mubr.msk.f32.gmra.mrb[6].mxu1 %vm66_vm0, %v64_v22  ;;  %728 = vmatmul.mubr.msk.f32.gmra.mrb[2].mxu0 %vm196_vm1, %v52_v24  ;;  %v406_v37 = vld [vmem:[%s1041_s5] sm:$0xff] }
  0x14   :  { %730 = vmatprep.mubr.msk.f32.mxu0 %vm196_vm1, %v53_v25  ;;  %752 = vmatprep.mubr.msk.f32.mxu1 %vm434_vm5, %v406_v37  ;;  %v409_v37 = vld [vmem:[%s1041_s5 + $0x18] sm:$0xff]  ;;  %p818_p3 = por %p817_p2, %p816_p1 }
  0x15   :  { %366 = vperm.xlu0 %809, %v332_v27   ;;  %371 = vperm.xlu1 %810, %v333_v30  }
  0x16   :  { %p819_p4 = pnand %p818_p3, %p812_p0 }
  0x17   :  { %731 = vmatmul.mubr.msk.f32.gmra.mrb[4].mxu0 %vm196_vm1, %v54_v28 }
  0x18   :  { %733 = vmatprep.mubr.msk.f32.mxu0 %vm196_vm1, %v55_v29 }
  0x19   :  { %416 = vperm.xlu0 %809, %v410_v31   ;;  %421 = vperm.xlu1 %810, %v411_v33  }
  0x1b   :  { %734 = vmatmul.mubr.msk.f32.gmra.mrb[6].mxu0 %vm196_vm1, %v56_v32 }
  0x1d   :  { %426 = vperm.xlu0 %809, %v412_v34   ;;  %431 = vperm.xlu1 %810, %v413_v35   ;;  %v407_v35 = vld [vmem:[%s1041_s5 + $0x8] sm:$0xff] }
  0x21   :  { %548 = vperm.xlu0 %809, %v545_v36   ;;  %v408_v36 = vld [vmem:[%s1041_s5 + $0x10] sm:$0xff] }
  0x88   :  { %v337_v40 = vpop.permute.xlu0 %336  ;;  %v347_v42 = vpop.permute.xlu1 %346 }
  0x8c   :  { %v342_v49 = vpop.permute.xlu0 %341  ;;  %v352_v50 = vpop.permute.xlu1 %351 }
  0x90   :  { %v362_v0 = vpop.permute.xlu1 %361  ;;  %v357_v4 = vpop.permute.xlu0 %356 }
  0x94   :  { %v372_v21 = vpop.permute.xlu1 %371  ;;  %v367_v24 = vpop.permute.xlu0 %366 }
  0xda   :  { %v710_v38 = vpop.f32.mrb[0].mxu1 }
  0xdb   :  { %v157_v39 = vpop.f32.mrb[1].mxu1 }
  0xde   :  { %v713_v41 = vpop.f32.mrb[2].mxu1 }
  0xdf   :  { %v167_v43 = vpop.f32.mrb[3].mxu1 }
  0xe2   :  { %v716_v44 = vpop.f32.mrb[4].mxu1  ;;  %v726_v45 = vpop.f32.mrb[0].mxu0 }
  0xe3   :  { %v177_v46 = vpop.f32.mrb[5].mxu1  ;;  %v293_v47 = vadd.f32 %v726_v45, %v710_v38  ;;  %v287_v48 = vpop.f32.mrb[1].mxu0  ;;  %v837_v38 = vmov 0.0|0.0  }
  0xe4   :  { %v288_v51 = vadd.f32 %v287_v48, %v157_v39  ;;  %789 = vmatprep.subr.bf16.mxu0 %v837_v38  ;;  %v839_v39 = vmov 0.0  }
  0xe5   :  { %v375_v52 = vadd.f32 %v342_v49, %v293_v47  ;;  %766 = vmatprep.mubr.msk.f32.mxu0 %vm838_vm14, %v839_v39 }
  0xe6   :  { %v719_v53 = vpop.f32.mrb[6].mxu1  ;;  %v374_v54 = vadd.f32 %v337_v40, %v288_v51  ;;  %v729_v55 = vpop.f32.mrb[2].mxu0 }
  0xe7   :  { %v187_v56 = vpop.f32.mrb[7].mxu1  ;;  %vm383_vm6 = vcmp.gt.f32.partialorder %v375_v52, 0.0  ;;  %v391_v57 = vmul.f32 0.01, %v375_v52  ;;  %v303_v58 = vadd.f32 %v729_v55, %v713_v41  ;;  %v297_v59 = vpop.f32.mrb[3].mxu0 }
  0xe8   :  { %vm382_vm7 = vcmp.gt.f32.partialorder %v374_v54, 0.0  ;;  %v390_v60 = vmul.f32 0.01, %v374_v54  ;;  %v298_v61 = vadd.f32 %v297_v59, %v167_v43  ;;  %v422_v40 = vpop.permute.xlu1 %421  ;;  %v417_v41 = vpop.permute.xlu0 %416 }
  0xe9   :  { %v377_v62 = vadd.f32 %v352_v50, %v303_v58  ;;  %v399_v63 = vsel %vm383_vm6, %v375_v52, %v391_v57 }
  0xea   :  { %v376_v1 = vadd.f32 %v347_v42, %v298_v61  ;;  %v732_v2 = vpop.f32.mrb[4].mxu0  ;;  %v398_v3 = vsel %vm382_vm7, %v374_v54, %v390_v60 }
  0xeb   :  { %vm385_vm8 = vcmp.gt.f32.partialorder %v377_v62, 0.0  ;;  %v393_v5 = vmul.f32 0.01, %v377_v62  ;;  %v313_v6 = vadd.f32 %v732_v2, %v716_v44  ;;  %v307_v8 = vpop.f32.mrb[5].mxu0  ;;  %v773_v9 = vpack.c.bf16 %v399_v63, %v398_v3 }
  0xec   :  { %vm384_vm9 = vcmp.gt.f32.partialorder %v376_v1, 0.0  ;;  %v392_v10 = vmul.f32 0.01, %v376_v1  ;;  %v308_v11 = vadd.f32 %v307_v8, %v177_v46  ;;  %v432_v47 = vpop.permute.xlu1 %431  ;;  %v427_v50 = vpop.permute.xlu0 %426  ;;  %v553_v63 = vsub.s32 0, %v909_v7 }
  0xed   :  { %v379_v12 = vadd.f32 %v362_v0, %v313_v6  ;;  %774 = vmatprep.subr.bf16.mxu1 %v773_v9  ;;  %v401_v13 = vsel %vm385_vm8, %v377_v62, %v393_v5  ;;  %v544_v62 = vld [vmem:[%s1043_s7] sm:$0x1] }
  0xee   :  { %v378_v14 = vadd.f32 %v357_v4, %v308_v11  ;;  %v735_v15 = vpop.f32.mrb[6].mxu0  ;;  %776 = vmatpush3.bf16.msra.mxu1 %v773_v9  ;;  %v400_v16 = vsel %vm384_vm9, %v376_v1, %v392_v10 }
  0xef   :  { %vm387_vm10 = vcmp.gt.f32.partialorder %v379_v12, 0.0  ;;  %v395_v17 = vmul.f32 0.01, %v379_v12  ;;  %v323_v18 = vadd.f32 %v735_v15, %v719_v53  ;;  %v317_v19 = vpop.f32.mrb[7].mxu0  ;;  %v777_v20 = vpack.c.bf16 %v401_v13, %v400_v16 }
  0xf0   :  { %vm386_vm11 = vcmp.gt.f32.partialorder %v378_v14, 0.0  ;;  %v394_v22 = vmul.f32 0.01, %v378_v14  ;;  %v318_v23 = vadd.f32 %v317_v19, %v187_v56  ;;  %v549_v0 = vpop.permute.xlu0 %548 }
  0xf1   :  { %v381_v25 = vadd.f32 %v372_v21, %v323_v18  ;;  %778 = vmatprep.subr.bf16.mxu1 %v777_v20  ;;  %v403_v26 = vsel %vm387_vm10, %v379_v12, %v395_v17  ;;  %v554_v1 = vrot.slane %v549_v0, %v553_v63 }
  0xf2   :  { %v380_v27 = vadd.f32 %v367_v24, %v318_v23  ;;  %780 = vmatpush3.bf16.msra.mxu1 %v777_v20  ;;  %v402_v28 = vsel %vm386_vm11, %v378_v14, %v394_v22 }
  0xf3   :  { %vm389_vm12 = vcmp.gt.f32.partialorder %v381_v25, 0.0  ;;  %v397_v29 = vmul.f32 0.01, %v381_v25  ;;  %v781_v30 = vpack.c.bf16 %v403_v26, %v402_v28 }
  0xf4   :  { %vm388_vm13 = vcmp.gt.f32.partialorder %v380_v27, 0.0  ;;  %v396_v31 = vmul.f32 0.01, %v380_v27 }
  0xf5   :  { %782 = vmatprep.subr.bf16.mxu1 %v781_v30  ;;  %v405_v32 = vsel %vm389_vm12, %v381_v25, %v397_v29 }
  0xf6   :  { %784 = vmatpush3.bf16.msra.mxu1 %v781_v30  ;;  %v404_v33 = vsel %vm388_vm13, %v380_v27, %v396_v31 }
  0xf7   :  { %v785_v34 = vpack.c.bf16 %v405_v32, %v404_v33 }
  0xf9   :  { %786 = vmatprep.subr.bf16.mxu1 %v785_v34 }
  0xfa   :  { %788 = vmatpush3.bf16.msra.mxu1 %v785_v34 }
  0xfd   :  { %753 = vmatmul.mubr.msk.f32.vlgmr.msra.gmra.mrb[8].mxu1 %vm434_vm5, %v407_v35 }
  0xfe   :  { %755 = vmatprep.mubr.msk.f32.mxu1 %vm434_vm5, %v408_v36 }
 0x101   :  { %756 = vmatmul.mubr.msk.f32.gmra.mrb[10].mxu1 %vm434_vm5, %v409_v37 }
 0x1d0   :  { %v754_v42 = vpop.f32.mrb[8].mxu1 }
 0x1d1   :  { %v519_v43 = vadd.f32 %v754_v42, %v422_v40  ;;  %v513_v44 = vpop.f32.mrb[9].mxu1 }
 0x1d2   :  { %v514_v45 = vadd.f32 %v513_v44, %v417_v41 }
 0x1d3   :  { %vm533_vm15 = vcmp.gt.f32.partialorder %v519_v43, 0.0  ;;  %v537_v46 = vmul.f32 0.01, %v519_v43 }
 0x1d4   :  { %vm532_vm0 = vcmp.gt.f32.partialorder %v514_v45, 0.0  ;;  %v536_v48 = vmul.f32 0.01, %v514_v45  ;;  %v757_v49 = vpop.f32.mrb[10].mxu1 }
 0x1d5   :  { %v541_v51 = vsel %vm533_vm15, %v519_v43, %v537_v46  ;;  %v529_v52 = vadd.f32 %v757_v49, %v432_v47  ;;  %v523_v53 = vpop.f32.mrb[11].mxu1 }
 0x1d6   :  { %v540_v54 = vsel %vm532_vm0, %v514_v45, %v536_v48  ;;  %v524_v55 = vadd.f32 %v523_v53, %v427_v50 }
 0x1d7   :  { %v790_v56 = vpack.c.bf16 %v541_v51, %v540_v54  ;;  %vm535_vm1 = vcmp.gt.f32.partialorder %v529_v52, 0.0  ;;  %v539_v57 = vmul.f32 0.01, %v529_v52 }
 0x1d8   :  { %vm534_vm2 = vcmp.gt.f32.partialorder %v524_v55, 0.0  ;;  %v538_v58 = vmul.f32 0.01, %v524_v55 }
 0x1d9   :  { %v543_v59 = vsel %vm535_vm1, %v529_v52, %v539_v57  ;;  %791 = vmatpush3.bf16.msra.mxu0 %v790_v56 }
 0x1da   :  { %v542_v60 = vsel %vm534_vm2, %v524_v55, %v538_v58  ;;  %792 = vmatprep.subr.bf16.mxu0 %v837_v38 }
 0x1db   :  { %v793_v61 = vpack.c.bf16 %v543_v59, %v542_v60 }
 0x1dd   :  { %794 = vmatpush3.bf16.msra.mxu0 %v793_v61 }
 0x1e0   :  { %767 = vmatmul.mubr.msk.f32.vlgmr.msra.gmra.mrb[8].mxu0 %vm555_vm3, %v544_v62 }
 0x2b3   :  { %v625_v2 = vpop.f32.mrb[8].mxu0 }
 0x2b4   :  { %v626_v3 = vadd.f32 %v625_v2, %v554_v1  ;;  %v768_v4 = vpop.f32.mrb[9].mxu0 }
 0x2b6   :  { %629 = vst [vmem:[#allocation3] sm:$0x1] %v626_v3 }
 0x2b7   :  { %822 = shalt.err (!%p819_p4)
}
 0x2b8   :  { %s823_s29 = scalar_lea.hbm %s1045_s9, 16 }
 0x2b9   :  { %p824_p5 = scmp.ne.s32.totalorder %s1045_s9, %s823_s29  ;;  %p827_p6 = scmp.lt.u32.totalorder %s823_s29, %s1045_s9 }
 0x2bb   :  { %p829_p7 = pnand %p827_p6, %p824_p5 }
 0x2bd   :  { %832 = shalt.err (!%p829_p7)
}
 0x2be   :  { %639 = dma.vmem_to_hbm [thread:$0]  %s637_s3, 16, %s1045_s9, [#allocation4]  }
 0x2bf   :  { %833 = dma.done.wait [#allocation4], 16  }
 0x2c0   :  { %834 = vsyncadd [#allocation4], 4294967280 }
 0x2c1   :  { %643 = vsyncpa [#allocation4], 1 }

</bundles_post_ra>
